<compile_context>
chip_gen: v6e
topology: v6e:2x2x1
jax: 0.10.0
libtpu: 0.0.40
codegen_flags: <defaults>
</compile_context>

<pallas_src>
import jax
import jax.numpy as jnp
from jax import lax
from jax.experimental import pallas as pl
from jax.experimental.pallas import tpu as pltpu

# ---- cfg constants (cfg.MODEL.HEADS.SCALE / MARGIN, cfg.META.LR) ----
SCALE = 64.0
MARGIN = 0.25
META_LR = 0.1

_NEG = -1e30  # softmax mask value for padded class columns


def _round_up(x, m):
    return (x + m - 1) // m * m


def _circle_logits(sim, t_bool):
    """Circle logits; also returns the (detached) alpha = d logits / (S d sim)."""
    alpha_p = jnp.maximum((1.0 + MARGIN) - sim, 0.0)
    alpha_n = jnp.maximum(sim + MARGIN, 0.0)
    alpha = jnp.where(t_bool, alpha_p, alpha_n)          # select, not t*a+(1-t)*b
    delta = jnp.where(t_bool, 1.0 - MARGIN, MARGIN)
    return SCALE * alpha * (sim - delta), alpha


def _make_kernel(num_classes, padded_classes, tile_c, cache_sim):
    mask_pad_cols = padded_classes != num_classes

    def kernel(x_ref, w_ref, tgt_ref, mask_ref, out_ref,
               xn_s, g_s, m_s, l_s, *maybe_sim_cache):
        sim_cache = maybe_sim_cache[0] if cache_sim else None
        p = pl.program_id(0)   # 0: softmax-stats pass, 1: update/emit pass
        k = pl.program_id(1)   # class-tile index
        b = xn_s.shape[0]

        # ---- one-time setup: normalize features, Gram matrix, softmax state ----
        @pl.when(jnp.logical_and(p == 0, k == 0))
        def _init():
            x = x_ref[...]                                       # (B, D) f32
            nrm = jnp.sqrt(jnp.sum(x * x, axis=-1, keepdims=True))
            xn = x / jnp.maximum(nrm, 1e-12)                     # F.normalize
            xn_bf = xn.astype(jnp.bfloat16)
            xn_s[...] = xn_bf
            g_s[...] = lax.dot_general(                          # G = xn @ xn^T
                xn_bf, xn_bf, (((1,), (1,)), ((), ())),
                preferred_element_type=jnp.float32)
            m_s[...] = jnp.full(m_s.shape, -jnp.inf, jnp.float32)
            l_s[...] = jnp.zeros(l_s.shape, jnp.float32)

        # ---- per-tile class ids / one-hot (no dense one-hot in HBM) ----
        cls = k * tile_c + lax.broadcasted_iota(jnp.int32, (b, tile_c), 1)
        t_b = cls == tgt_ref[...]

        def masked_circle(sim):
            logits, alpha = _circle_logits(sim, t_b)
            if mask_pad_cols:
                logits = jnp.where(cls < num_classes, logits, _NEG)
            return logits, alpha

        @pl.when(p == 0)
        def _pass0():  # online row-max / exp-sum over the class axis
            sim = lax.dot_general(                               # bf16 MXU, f32 acc
                xn_s[...], w_ref[...], (((1,), (0,)), ((), ())),
                preferred_element_type=jnp.float32)              # (B, TC)
            if cache_sim:
                sim_cache[k] = sim                               # reuse in pass 1
            logits, _ = masked_circle(sim)
            m_prev = m_s[...]
            m_new = jnp.maximum(m_prev, jnp.max(logits, axis=-1, keepdims=True))
            l_s[...] = (l_s[...] * jnp.exp(m_prev - m_new)
                        + jnp.sum(jnp.exp(logits - m_new), axis=-1, keepdims=True))
            m_s[...] = m_new

        @pl.when(p == 1)
        def _pass1():
            if cache_sim:
                sim = sim_cache[k]                               # no W refetch/matmul
            else:
                sim = lax.dot_general(
                    xn_s[...], w_ref[...], (((1,), (0,)), ((), ())),
                    preferred_element_type=jnp.float32)
            logits, alpha = masked_circle(sim)
            mask = mask_ref[...]                                 # (B, 1), sub == 1
            n_sel = jnp.maximum(jnp.sum(mask, keepdims=True), 1.0)   # guard /0
            row_w = mask / n_sel
            prob = jnp.exp(logits - m_s[...]) * pl.reciprocal(l_s[...], approx=True)
            dlogits = (prob - t_b.astype(jnp.float32)) * row_w   # masked-mean CE grad
            dsim = dlogits * (SCALE * alpha)                     # alphas detached
            # new_sim = xn @ (W - lr * dsim^T xn)^T = sim - lr * (xn xn^T) @ dsim
            corr = lax.dot_general(
                g_s[...], dsim, (((1,), (0,)), ((), ())),
                preferred_element_type=jnp.float32)
            new_logits, _ = _circle_logits(sim - META_LR * corr, t_b)
            out_ref[...] = new_logits

    return kernel


def circle_meta_forward(features, targets, sub, weight):
    B, D = features.shape
    C = weight.shape[0]
    Bp = _round_up(B, 16)          # 16 rows: bf16 sublane-friendly
    Dp = _round_up(D, 128)
    Cp = _round_up(C, 128)

    # Largest class tile among {512,256,128} that divides Cp and keeps the
    # double-buffered W tile under ~8 MiB.
    tile_c = 128
    for cand in (512, 256):
        if Cp % cand == 0 and 2 * Dp * cand * 2 <= (8 << 20):
            tile_c = cand
            break
    kt = Cp // tile_c

    # Cache sim tiles in VMEM if the cache is modest (<= 16 MiB) so pass 1
    # skips the big matmul and the W refetch entirely.
    sim_cache_bytes = Bp * Cp * 4
    cache_sim = sim_cache_bytes <= (16 << 20)

    x = jnp.zeros((Bp, Dp), jnp.float32).at[:B, :D].set(features.astype(jnp.float32))
    # weight streamed as bf16 in (D, C) layout -> canonical (B,D)x(D,TC) MXU matmul
    w_t = (jnp.zeros((Dp, Cp), jnp.float32)
           .at[:D, :C].set(jnp.transpose(weight.astype(jnp.float32)))
           .astype(jnp.bfloat16))
    tgt = jnp.zeros((Bp, 1), jnp.int32).at[:B, 0].set(targets.astype(jnp.int32))
    msk = jnp.zeros((Bp, 1), jnp.float32).at[:B, 0].set((sub == 1).astype(jnp.float32))

    if cache_sim:
        # pass 0 streams tile k; pass 1 parks on the already-resident last tile
        # (W is unused there) -> zero extra W DMAs in pass 1.
        w_map = lambda p, k: (0, k * (1 - p) + (kt - 1) * p)
    else:
        w_map = lambda p, k: (0, k)

    scratch_shapes = [
        pltpu.VMEM((Bp, Dp), jnp.bfloat16),   # xn (normalized features)
        pltpu.VMEM((Bp, Bp), jnp.float32),    # G = xn @ xn^T
        pltpu.VMEM((Bp, 1), jnp.float32),     # running row max
        pltpu.VMEM((Bp, 1), jnp.float32),     # running exp-sum
    ]
    if cache_sim:
        scratch_shapes.append(pltpu.VMEM((kt, Bp, tile_c), jnp.float32))

    vmem_est = (2 * Bp * Dp * 4              # x (double-buffered)
                + 2 * Dp * tile_c * 2        # W tile bf16 (double-buffered)
                + 2 * Bp * tile_c * 4        # out tile (double-buffered)
                + Bp * Dp * 2 + Bp * Bp * 4 + Bp * 8
                + (Bp * Cp * 4 if cache_sim else 0))
    vmem_limit = int(min(128 << 20, max(32 << 20, vmem_est + (4 << 20))))

    out = pl.pallas_call(
        _make_kernel(C, Cp, tile_c, cache_sim),
        out_shape=jax.ShapeDtypeStruct((Bp, Cp), jnp.float32),
        grid_spec=pltpu.PrefetchScalarGridSpec(
            num_scalar_prefetch=0,
            grid=(2, kt),
            in_specs=[
                pl.BlockSpec((Bp, Dp), lambda p, k: (0, 0)),      # x (stays resident)
                pl.BlockSpec((Dp, tile_c), w_map),                # W^T tile, streamed
                pl.BlockSpec((Bp, 1), lambda p, k: (0, 0)),       # int32 targets
                pl.BlockSpec((Bp, 1), lambda p, k: (0, 0)),       # sub mask
            ],
            # pass 0 parks on block 0 (never written); pass 1 emits block k.
            # Each output block index is visited in one consecutive run.
            out_specs=pl.BlockSpec((Bp, tile_c), lambda p, k: (0, k * p)),
            scratch_shapes=scratch_shapes),
        compiler_params=pltpu.CompilerParams(
            # Both grid axes carry state (online softmax over C, then reuse of
            # the stats / sim cache), so they must be "arbitrary".  Megacore
            # batch-split is not applicable: the Gram correction couples rows.
            dimension_semantics=("arbitrary", "arbitrary"),
            vmem_limit_bytes=vmem_limit),
    )(x, w_t, tgt, msk)
    return out[:B, :C]


# ---------------- pure-JAX reference (for validation) ----------------
def _ref_forward(features, targets, sub, weight, mxu_bf16=True):
    """Autodiff reference.  mxu_bf16=True mirrors the kernel's bf16 MXU inputs
    (f32 accumulation) so the numeric comparison stays apples-to-apples."""
    C = weight.shape[0]
    t_oh = jax.nn.one_hot(targets, C, dtype=jnp.float32)
    mask = (sub == 1).astype(jnp.float32)

    def mm(a, b):
        if mxu_bf16:
            a = a.astype(jnp.bfloat16)
            b = b.astype(jnp.bfloat16)
        return jnp.dot(a, b, preferred_element_type=jnp.float32)

    def norm_forward(x, w):
        xn = x / jnp.maximum(jnp.sqrt(jnp.sum(x * x, -1, keepdims=True)), 1e-12)
        sim = mm(xn, w.T)
        sim_d = lax.stop_gradient(sim)
        alpha_p = jax.nn.relu(1.0 + MARGIN - sim_d)
        alpha_n = jax.nn.relu(sim_d + MARGIN)
        s_p = SCALE * alpha_p * (sim - (1.0 - MARGIN))
        s_n = SCALE * alpha_n * (sim - MARGIN)
        return t_oh * s_p + (1.0 - t_oh) * s_n

    def loss_fn(w):
        logits = norm_forward(features, w)
        logp = jax.nn.log_softmax(logits, axis=-1)
        ce = -jnp.sum(t_oh * logp, axis=-1)
        return jnp.sum(ce * mask) / jnp.maximum(jnp.sum(mask), 1.0)

    grad_w = jax.grad(loss_fn)(weight)
    return norm_forward(features, weight - META_LR * grad_w)


if __name__ == "__main__":
    B, D, C = 8, 32, 16  # batch, in_feat, num_classes (padded internally)

    key = jax.random.PRNGKey(0)
    k1, k2, k3 = jax.random.split(key, 3)
    features = jax.random.normal(k1, (B, D), dtype=jnp.float32)
    targets = jax.random.randint(k2, (B,), 0, C, dtype=jnp.int32)
    sub = jnp.array([1, 0, 1, 1, 0, 1, 1, 0], dtype=jnp.int32)
    # deterministic init (torch.Tensor(num_classes, in_feat) is uninitialized
    # in the reference; use a small gaussian here)
    weight = 0.1 * jax.random.normal(k3, (C, D), dtype=jnp.float32)

    out = jax.block_until_ready(circle_meta_forward(features, targets, sub, weight))
    ref = _ref_forward(features, targets, sub, weight)

    assert out.shape == (B, C)
    err = float(jnp.max(jnp.abs(out - ref)))
    scl = float(jnp.max(jnp.abs(ref)))
    # bf16 MXU matmuls + approx reciprocal -> loosened tolerance.
    tol = 5e-2 * scl + 0.5
    assert err <= tol, f"max abs err {err:.4f} > tol {tol:.4f} (ref scale {scl:.2f})"
    print("KERNEL_OK")
</pallas_src>

<mosaic_0001>
module attributes {stable_mosaic.version = 11 : i64} {
  func.func @kernel(%arg0: i32, %arg1: i32, %arg2: memref<16x128xf32, #tpu.memory_space<vmem>>, %arg3: memref<128x128xbf16, #tpu.memory_space<vmem>>, %arg4: memref<16x1xi32, #tpu.memory_space<vmem>>, %arg5: memref<16x1xf32, #tpu.memory_space<vmem>>, %arg6: memref<16x128xf32, #tpu.memory_space<vmem>>, %arg7: memref<16x128xbf16, #tpu.memory_space<vmem>>, %arg8: memref<16x16xf32, #tpu.memory_space<vmem>>, %arg9: memref<16x1xf32, #tpu.memory_space<vmem>>, %arg10: memref<16x1xf32, #tpu.memory_space<vmem>>, %arg11: memref<1x16x128xf32, #tpu.memory_space<vmem>>) attributes {dimension_semantics = [#tpu.dimension_semantics<arbitrary>, #tpu.dimension_semantics<arbitrary>], iteration_bounds = array<i64: 2, 1>, scalar_prefetch = 0 : i64, scratch_operands = 5 : i64, tpu.core_type = #tpu.core_type<tc>, window_params = [{pipeline_mode = #tpu.pipeline_mode<synchronous>, transform_indices = @transform_0, window_bounds = array<i64: 16, 128>}, {transform_indices = @transform_1, window_bounds = array<i64: 128, 128>}, {pipeline_mode = #tpu.pipeline_mode<synchronous>, transform_indices = @transform_2, window_bounds = array<i64: 16, 1>}, {pipeline_mode = #tpu.pipeline_mode<synchronous>, transform_indices = @transform_3, window_bounds = array<i64: 16, 1>}, {transform_indices = @transform_4, window_bounds = array<i64: 16, 128>}]} {
    %c0_i32 = arith.constant 0 : i32
    %0 = arith.cmpi eq, %arg0, %c0_i32 : i32
    %c0_i32_0 = arith.constant 0 : i32
    %1 = arith.cmpi eq, %arg1, %c0_i32_0 : i32
    %2 = arith.andi %0, %1 : i1
    %3 = arith.extui %2 : i1 to i32
    %c0_i32_1 = arith.constant 0 : i32
    %4 = arith.cmpi ne, %3, %c0_i32_1 : i32
    scf.if %4 {
      %c0_6 = arith.constant 0 : index
      %c0_7 = arith.constant 0 : index
      %18 = vector.load %arg2[%c0_6, %c0_7] : memref<16x128xf32, #tpu.memory_space<vmem>>, vector<16x128xf32>
      %19 = arith.mulf %18, %18 : vector<16x128xf32>
      %cst = arith.constant dense<0.000000e+00> : vector<16xf32>
      %20 = vector.multi_reduction <add>, %19, %cst [1] : vector<16x128xf32> to vector<16xf32>
      %21 = vector.shape_cast %20 : vector<16xf32> to vector<16x1xf32>
      %22 = math.sqrt %21 : vector<16x1xf32>
      %cst_8 = arith.constant 9.99999996E-13 : f32
      %23 = vector.broadcast %cst_8 : f32 to vector<16x1xf32>
      %24 = arith.maximumf %22, %23 : vector<16x1xf32>
      %25 = vector.broadcast %24 : vector<16x1xf32> to vector<16x128xf32>
      %26 = arith.divf %18, %25 : vector<16x128xf32>
      %27 = arith.truncf %26 : vector<16x128xf32> to vector<16x128xbf16>
      %c0_9 = arith.constant 0 : index
      %c0_10 = arith.constant 0 : index
      %28 = vector.load %arg7[%c0_9, %c0_10] : memref<16x128xbf16, #tpu.memory_space<vmem>>, vector<16x128xbf16>
      tpu.vector_store %arg7[%c0_9, %c0_10], %27 {strides = array<i32>} : memref<16x128xbf16, #tpu.memory_space<vmem>>, vector<16x128xbf16>,
      %cst_11 = arith.constant dense<0.000000e+00> : vector<16x16xf32>
      %29 = tpu.matmul %27, %27, %cst_11 {dimension_numbers = #tpu.dot_dimension_numbers<[1], [1], [0], [0], [0, 0, 1, 0], [], []>} : vector<16x128xbf16>, vector<16x128xbf16>, vector<16x16xf32> -> vector<16x16xf32>
      %c0_12 = arith.constant 0 : index
      %c0_13 = arith.constant 0 : index
      %30 = vector.load %arg8[%c0_12, %c0_13] : memref<16x16xf32, #tpu.memory_space<vmem>>, vector<16x16xf32>
      tpu.vector_store %arg8[%c0_12, %c0_13], %29 {strides = array<i32>} : memref<16x16xf32, #tpu.memory_space<vmem>>, vector<16x16xf32>,
      %cst_14 = arith.constant 0xFF800000 : f32
      %31 = vector.broadcast %cst_14 : f32 to vector<16x1xf32>
      %c0_15 = arith.constant 0 : index
      %c0_16 = arith.constant 0 : index
      %32 = vector.load %arg9[%c0_15, %c0_16] : memref<16x1xf32, #tpu.memory_space<vmem>>, vector<16x1xf32>
      tpu.vector_store %arg9[%c0_15, %c0_16], %31 {strides = array<i32>} : memref<16x1xf32, #tpu.memory_space<vmem>>, vector<16x1xf32>,
      %cst_17 = arith.constant 0.000000e+00 : f32
      %33 = vector.broadcast %cst_17 : f32 to vector<16x1xf32>
      %c0_18 = arith.constant 0 : index
      %c0_19 = arith.constant 0 : index
      %34 = vector.load %arg10[%c0_18, %c0_19] : memref<16x1xf32, #tpu.memory_space<vmem>>, vector<16x1xf32>
      tpu.vector_store %arg10[%c0_18, %c0_19], %33 {strides = array<i32>} : memref<16x1xf32, #tpu.memory_space<vmem>>, vector<16x1xf32>,
    } else {
    }
    %c128_i32 = arith.constant 128 : i32
    %5 = arith.muli %arg1, %c128_i32 : i32
    %6 = tpu.iota {dimensions = array<i32: 1>} : vector<16x128xi32>
    %7 = vector.broadcast %5 : i32 to vector<16x128xi32>
    %8 = arith.addi %7, %6 : vector<16x128xi32>
    %c0 = arith.constant 0 : index
    %c0_2 = arith.constant 0 : index
    %9 = vector.load %arg4[%c0, %c0_2] : memref<16x1xi32, #tpu.memory_space<vmem>>, vector<16x1xi32>
    %10 = vector.broadcast %9 : vector<16x1xi32> to vector<16x128xi32>
    %11 = arith.cmpi eq, %8, %10 : vector<16x128xi32>
    %c0_i32_3 = arith.constant 0 : i32
    %12 = arith.cmpi eq, %arg0, %c0_i32_3 : i32
    %13 = arith.extui %12 : i1 to i32
    %c0_i32_4 = arith.constant 0 : i32
    %14 = arith.cmpi ne, %13, %c0_i32_4 : i32
    scf.if %14 {
      %c0_6 = arith.constant 0 : index
      %c0_7 = arith.constant 0 : index
      %18 = vector.load %arg7[%c0_6, %c0_7] : memref<16x128xbf16, #tpu.memory_space<vmem>>, vector<16x128xbf16>
      %c0_8 = arith.constant 0 : index
      %c0_9 = arith.constant 0 : index
      %19 = vector.load %arg3[%c0_8, %c0_9] : memref<128x128xbf16, #tpu.memory_space<vmem>>, vector<128x128xbf16>
      %cst = arith.constant dense<0.000000e+00> : vector<16x128xf32>
      %20 = tpu.matmul %18, %19, %cst {dimension_numbers = #tpu.dot_dimension_numbers<[1], [0], [0], [1], [0, 0, 1, 1], [], []>} : vector<16x128xbf16>, vector<128x128xbf16>, vector<16x128xf32> -> vector<16x128xf32>
      %21 = arith.index_cast %arg1 : i32 to index
      %c0_10 = arith.constant 0 : index
      %c0_11 = arith.constant 0 : index
      %22 = vector.load %arg11[%21, %c0_10, %c0_11] : memref<1x16x128xf32, #tpu.memory_space<vmem>>, vector<1x16x128xf32>
      %23 = vector.shape_cast %22 : vector<1x16x128xf32> to vector<16x128xf32>
      %24 = vector.shape_cast %20 : vector<16x128xf32> to vector<1x16x128xf32>
      tpu.vector_store %arg11[%21, %c0_10, %c0_11], %24 {strides = array<i32>} : memref<1x16x128xf32, #tpu.memory_space<vmem>>, vector<1x16x128xf32>,
      %cst_12 = arith.constant 1.250000e+00 : f32
      %25 = vector.broadcast %cst_12 : f32 to vector<16x128xf32>
      %26 = arith.subf %25, %20 : vector<16x128xf32>
      %cst_13 = arith.constant 0.000000e+00 : f32
      %27 = vector.broadcast %cst_13 : f32 to vector<16x128xf32>
      %28 = arith.maximumf %26, %27 : vector<16x128xf32>
      %cst_14 = arith.constant 2.500000e-01 : f32
      %29 = vector.broadcast %cst_14 : f32 to vector<16x128xf32>
      %30 = arith.addf %20, %29 : vector<16x128xf32>
      %cst_15 = arith.constant 0.000000e+00 : f32
      %31 = vector.broadcast %cst_15 : f32 to vector<16x128xf32>
      %32 = arith.maximumf %30, %31 : vector<16x128xf32>
      %33 = arith.select %11, %28, %32 : vector<16x128xi1>, vector<16x128xf32>
      %cst_16 = arith.constant 7.500000e-01 : f32
      %cst_17 = arith.constant 2.500000e-01 : f32
      %34 = vector.broadcast %cst_16 : f32 to vector<16x128xf32>
      %35 = vector.broadcast %cst_17 : f32 to vector<16x128xf32>
      %36 = arith.select %11, %34, %35 : vector<16x128xi1>, vector<16x128xf32>
      %cst_18 = arith.constant 6.400000e+01 : f32
      %37 = vector.broadcast %cst_18 : f32 to vector<16x128xf32>
      %38 = arith.mulf %37, %33 : vector<16x128xf32>
      %39 = arith.subf %20, %36 : vector<16x128xf32>
      %40 = arith.mulf %38, %39 : vector<16x128xf32>
      %c16_i32 = arith.constant 16 : i32
      %41 = vector.broadcast %c16_i32 : i32 to vector<16x128xi32>
      %42 = arith.cmpi slt, %8, %41 : vector<16x128xi32>
      %cst_19 = arith.constant -1.000000e+30 : f32
      %43 = vector.broadcast %cst_19 : f32 to vector<16x128xf32>
      %44 = arith.select %42, %40, %43 : vector<16x128xi1>, vector<16x128xf32>
      %c0_20 = arith.constant 0 : index
      %c0_21 = arith.constant 0 : index
      %45 = vector.load %arg9[%c0_20, %c0_21] : memref<16x1xf32, #tpu.memory_space<vmem>>, vector<16x1xf32>
      %cst_22 = arith.constant dense<0xFF800000> : vector<16xf32>
      %46 = vector.multi_reduction <maximumf>, %44, %cst_22 [1] : vector<16x128xf32> to vector<16xf32>
      %47 = vector.shape_cast %46 : vector<16xf32> to vector<16x1xf32>
      %48 = arith.maximumf %45, %47 : vector<16x1xf32>
      %c0_23 = arith.constant 0 : index
      %c0_24 = arith.constant 0 : index
      %49 = vector.load %arg10[%c0_23, %c0_24] : memref<16x1xf32, #tpu.memory_space<vmem>>, vector<16x1xf32>
      %50 = arith.subf %45, %48 : vector<16x1xf32>
      %51 = math.exp %50 : vector<16x1xf32>
      %52 = arith.mulf %49, %51 : vector<16x1xf32>
      %53 = vector.broadcast %48 : vector<16x1xf32> to vector<16x128xf32>
      %54 = arith.subf %44, %53 : vector<16x128xf32>
      %55 = math.exp %54 : vector<16x128xf32>
      %cst_25 = arith.constant dense<0.000000e+00> : vector<16xf32>
      %56 = vector.multi_reduction <add>, %55, %cst_25 [1] : vector<16x128xf32> to vector<16xf32>
      %57 = vector.shape_cast %56 : vector<16xf32> to vector<16x1xf32>
      %58 = arith.addf %52, %57 : vector<16x1xf32>
      %c0_26 = arith.constant 0 : index
      %c0_27 = arith.constant 0 : index
      %59 = vector.load %arg10[%c0_26, %c0_27] : memref<16x1xf32, #tpu.memory_space<vmem>>, vector<16x1xf32>
      tpu.vector_store %arg10[%c0_26, %c0_27], %58 {strides = array<i32>} : memref<16x1xf32, #tpu.memory_space<vmem>>, vector<16x1xf32>,
      %c0_28 = arith.constant 0 : index
      %c0_29 = arith.constant 0 : index
      %60 = vector.load %arg9[%c0_28, %c0_29] : memref<16x1xf32, #tpu.memory_space<vmem>>, vector<16x1xf32>
      tpu.vector_store %arg9[%c0_28, %c0_29], %48 {strides = array<i32>} : memref<16x1xf32, #tpu.memory_space<vmem>>, vector<16x1xf32>,
    } else {
    }
    %c1_i32 = arith.constant 1 : i32
    %15 = arith.cmpi eq, %arg0, %c1_i32 : i32
    %16 = arith.extui %15 : i1 to i32
    %c0_i32_5 = arith.constant 0 : i32
    %17 = arith.cmpi ne, %16, %c0_i32_5 : i32
    scf.if %17 {
      %18 = arith.index_cast %arg1 : i32 to index
      %c0_6 = arith.constant 0 : index
      %c0_7 = arith.constant 0 : index
      %19 = vector.load %arg11[%18, %c0_6, %c0_7] : memref<1x16x128xf32, #tpu.memory_space<vmem>>, vector<1x16x128xf32>
      %20 = vector.shape_cast %19 : vector<1x16x128xf32> to vector<16x128xf32>
      %cst = arith.constant 1.250000e+00 : f32
      %21 = vector.broadcast %cst : f32 to vector<16x128xf32>
      %22 = arith.subf %21, %20 : vector<16x128xf32>
      %cst_8 = arith.constant 0.000000e+00 : f32
      %23 = vector.broadcast %cst_8 : f32 to vector<16x128xf32>
      %24 = arith.maximumf %22, %23 : vector<16x128xf32>
      %cst_9 = arith.constant 2.500000e-01 : f32
      %25 = vector.broadcast %cst_9 : f32 to vector<16x128xf32>
      %26 = arith.addf %20, %25 : vector<16x128xf32>
      %cst_10 = arith.constant 0.000000e+00 : f32
      %27 = vector.broadcast %cst_10 : f32 to vector<16x128xf32>
      %28 = arith.maximumf %26, %27 : vector<16x128xf32>
      %29 = arith.select %11, %24, %28 : vector<16x128xi1>, vector<16x128xf32>
      %cst_11 = arith.constant 7.500000e-01 : f32
      %cst_12 = arith.constant 2.500000e-01 : f32
      %30 = vector.broadcast %cst_11 : f32 to vector<16x128xf32>
      %31 = vector.broadcast %cst_12 : f32 to vector<16x128xf32>
      %32 = arith.select %11, %30, %31 : vector<16x128xi1>, vector<16x128xf32>
      %cst_13 = arith.constant 6.400000e+01 : f32
      %33 = vector.broadcast %cst_13 : f32 to vector<16x128xf32>
      %34 = arith.mulf %33, %29 : vector<16x128xf32>
      %35 = arith.subf %20, %32 : vector<16x128xf32>
      %36 = arith.mulf %34, %35 : vector<16x128xf32>
      %c16_i32 = arith.constant 16 : i32
      %37 = vector.broadcast %c16_i32 : i32 to vector<16x128xi32>
      %38 = arith.cmpi slt, %8, %37 : vector<16x128xi32>
      %cst_14 = arith.constant -1.000000e+30 : f32
      %39 = vector.broadcast %cst_14 : f32 to vector<16x128xf32>
      %40 = arith.select %38, %36, %39 : vector<16x128xi1>, vector<16x128xf32>
      %c0_15 = arith.constant 0 : index
      %c0_16 = arith.constant 0 : index
      %41 = vector.load %arg5[%c0_15, %c0_16] : memref<16x1xf32, #tpu.memory_space<vmem>>, vector<16x1xf32>
      %42 = vector.shape_cast %41 : vector<16x1xf32> to vector<1x16x1xf32>
      %cst_17 = arith.constant dense<0.000000e+00> : vector<1xf32>
      %43 = vector.multi_reduction <add>, %42, %cst_17 [1, 2] : vector<1x16x1xf32> to vector<1xf32>
      %44 = vector.shape_cast %43 : vector<1xf32> to vector<1x1x1xf32>
      %45 = vector.extract %44[0, 0, 0] : f32 from vector<1x1x1xf32>
      %46 = vector.broadcast %45 : f32 to vector<1x1xf32>
      %cst_18 = arith.constant 1.000000e+00 : f32
      %47 = vector.broadcast %cst_18 : f32 to vector<1x1xf32>
      %48 = arith.maximumf %46, %47 : vector<1x1xf32>
      %49 = vector.broadcast %48 : vector<1x1xf32> to vector<16x1xf32>
      %50 = arith.divf %41, %49 : vector<16x1xf32>
      %c0_19 = arith.constant 0 : index
      %c0_20 = arith.constant 0 : index
      %51 = vector.load %arg9[%c0_19, %c0_20] : memref<16x1xf32, #tpu.memory_space<vmem>>, vector<16x1xf32>
      %52 = vector.broadcast %51 : vector<16x1xf32> to vector<16x128xf32>
      %53 = arith.subf %40, %52 : vector<16x128xf32>
      %54 = math.exp %53 : vector<16x128xf32>
      %c0_21 = arith.constant 0 : index
      %c0_22 = arith.constant 0 : index
      %55 = vector.load %arg10[%c0_21, %c0_22] : memref<16x1xf32, #tpu.memory_space<vmem>>, vector<16x1xf32>
      %56 = tpu.reciprocal %55 {approx = true} : vector<16x1xf32> -> vector<16x1xf32>
      %57 = vector.broadcast %56 : vector<16x1xf32> to vector<16x128xf32>
      %58 = arith.mulf %54, %57 : vector<16x128xf32>
      %59 = arith.extui %11 : vector<16x128xi1> to vector<16x128xi32>
      %60 = arith.sitofp %59 : vector<16x128xi32> to vector<16x128xf32>
      %61 = arith.subf %58, %60 : vector<16x128xf32>
      %62 = vector.broadcast %50 : vector<16x1xf32> to vector<16x128xf32>
      %63 = arith.mulf %61, %62 : vector<16x128xf32>
      %cst_23 = arith.constant 6.400000e+01 : f32
      %64 = vector.broadcast %cst_23 : f32 to vector<16x128xf32>
      %65 = arith.mulf %64, %29 : vector<16x128xf32>
      %66 = arith.mulf %63, %65 : vector<16x128xf32>
      %c0_24 = arith.constant 0 : index
      %c0_25 = arith.constant 0 : index
      %67 = vector.load %arg8[%c0_24, %c0_25] : memref<16x16xf32, #tpu.memory_space<vmem>>, vector<16x16xf32>
      %cst_26 = arith.constant dense<0.000000e+00> : vector<16x128xf32>
      %68 = tpu.matmul %67, %66, %cst_26 {dimension_numbers = #tpu.dot_dimension_numbers<[1], [0], [0], [1], [0, 0, 1, 1], [], []>} : vector<16x16xf32>, vector<16x128xf32>, vector<16x128xf32> -> vector<16x128xf32>
      %cst_27 = arith.constant 1.000000e-01 : f32
      %69 = vector.broadcast %cst_27 : f32 to vector<16x128xf32>
      %70 = arith.mulf %69, %68 : vector<16x128xf32>
      %71 = arith.subf %20, %70 : vector<16x128xf32>
      %cst_28 = arith.constant 1.250000e+00 : f32
      %72 = vector.broadcast %cst_28 : f32 to vector<16x128xf32>
      %73 = arith.subf %72, %71 : vector<16x128xf32>
      %cst_29 = arith.constant 0.000000e+00 : f32
      %74 = vector.broadcast %cst_29 : f32 to vector<16x128xf32>
      %75 = arith.maximumf %73, %74 : vector<16x128xf32>
      %cst_30 = arith.constant 2.500000e-01 : f32
      %76 = vector.broadcast %cst_30 : f32 to vector<16x128xf32>
      %77 = arith.addf %71, %76 : vector<16x128xf32>
      %cst_31 = arith.constant 0.000000e+00 : f32
      %78 = vector.broadcast %cst_31 : f32 to vector<16x128xf32>
      %79 = arith.maximumf %77, %78 : vector<16x128xf32>
      %80 = arith.select %11, %75, %79 : vector<16x128xi1>, vector<16x128xf32>
      %cst_32 = arith.constant 7.500000e-01 : f32
      %cst_33 = arith.constant 2.500000e-01 : f32
      %81 = vector.broadcast %cst_32 : f32 to vector<16x128xf32>
      %82 = vector.broadcast %cst_33 : f32 to vector<16x128xf32>
      %83 = arith.select %11, %81, %82 : vector<16x128xi1>, vector<16x128xf32>
      %cst_34 = arith.constant 6.400000e+01 : f32
      %84 = vector.broadcast %cst_34 : f32 to vector<16x128xf32>
      %85 = arith.mulf %84, %80 : vector<16x128xf32>
      %86 = arith.subf %71, %83 : vector<16x128xf32>
      %87 = arith.mulf %85, %86 : vector<16x128xf32>
      %c0_35 = arith.constant 0 : index
      %c0_36 = arith.constant 0 : index
      %88 = vector.load %arg6[%c0_35, %c0_36] : memref<16x128xf32, #tpu.memory_space<vmem>>, vector<16x128xf32>
      tpu.vector_store %arg6[%c0_35, %c0_36], %87 {strides = array<i32>} : memref<16x128xf32, #tpu.memory_space<vmem>>, vector<16x128xf32>,
    } else {
    }
    return
  }
  func.func @transform_0(%arg0: i32, %arg1: i32) -> (i32, i32) {
    %c0_i32 = arith.constant 0 : i32
    %c0_i32_0 = arith.constant 0 : i32
    %c0_i32_1 = arith.constant 0 : i32
    return %c0_i32, %c0_i32_0 : i32, i32
  }
  func.func @transform_1(%arg0: i32, %arg1: i32) -> (i32, i32) {
    %c1_i32 = arith.constant 1 : i32
    %0 = arith.subi %c1_i32, %arg0 : i32
    %1 = arith.muli %arg1, %0 : i32
    %c0_i32 = arith.constant 0 : i32
    %2 = arith.muli %c0_i32, %arg0 : i32
    %3 = arith.addi %1, %2 : i32
    %c0_i32_0 = arith.constant 0 : i32
    %c0_i32_1 = arith.constant 0 : i32
    return %c0_i32_0, %3 : i32, i32
  }
  func.func @transform_2(%arg0: i32, %arg1: i32) -> (i32, i32) {
    %c0_i32 = arith.constant 0 : i32
    %c0_i32_0 = arith.constant 0 : i32
    %c0_i32_1 = arith.constant 0 : i32
    return %c0_i32, %c0_i32_0 : i32, i32
  }
  func.func @transform_3(%arg0: i32, %arg1: i32) -> (i32, i32) {
    %c0_i32 = arith.constant 0 : i32
    %c0_i32_0 = arith.constant 0 : i32
    %c0_i32_1 = arith.constant 0 : i32
    return %c0_i32, %c0_i32_0 : i32, i32
  }
  func.func @transform_4(%arg0: i32, %arg1: i32) -> (i32, i32) {
    %0 = arith.muli %arg1, %arg0 : i32
    %c0_i32 = arith.constant 0 : i32
    %c0_i32_0 = arith.constant 0 : i32
    return %c0_i32, %0 : i32, i32
  }
}

</mosaic_0001>

<bundles_post_ra>
// kernel: tpu_custom_call.1
= control target key start
LH: loop header
LB: loop body
LE: loop exit
PB: predicated region body
PF: predicated region fallthrough
CT: control target
= control target key end

     0   :  { %9 = vsyncpa [#allocation8], 0  ;;  %s1286_s0 = inlined_call_operand.vmem [shape: f32[16,128], index: 0, kind: input, shape index: {}]   ;;  %s1287_s1 = inlined_call_operand.hbm [shape: bf16[128,128], index: 1, kind: input, shape index: {}]   ;;  %s1288_s2 = inlined_call_operand.vmem [shape: s32[16,1], index: 2, kind: input, shape index: {}]   ;;  %s1289_s3 = inlined_call_operand.vmem [shape: f32[16,1], index: 3, kind: input, shape index: {}]   ;;  %s1290_s4 = inlined_call_operand.hbm [shape: f32[16,128], index: 4, kind: output, shape index: {}]  }
   0x1   :  { %11 = vsyncpa [#allocation8 + $0x1], 0 }
   0x2   :  { %12 = vsyncpa [#allocation9], 0 }
   0x3   :  { %14 = vsyncpa [#allocation9 + $0x1], 0  ;;  %s1155_s15 = smov 0   ;;  %s1157_s16 = smov 0  }
   0x4   :  { %s1159_s17 = smov 0  }
   0x5 LB: > { %s841_s18 = sadd.s32 4294967295, %s1111_s17   ;;  %s842_s19 = sadd.s32 4294967294, %s1111_s17   ;;  %s1111_s17 = sphi %s1159_s17, %s20_s17   ;;  %s1107_s16 = sphi %s1157_s16, %s1298_s16   ;;  %s1103_s15 = sphi %s1155_s15, %s1297_s15  }
   0x6   : > { %s32_s20 = sadd.s32 1, %s1107_s16  ;;  %p844_p0 = scmp.ge.s32.totalorder %s1111_s17, 2 }
   0x7   : > { %p34_p1 = scmp.ge.s32.totalorder %s32_s20, 2  ;;  %p944_p2 = scmp.lt.s32.totalorder %s1111_s17, 2 }
   0x8   : > { %p945_p3 = scmp.eq.s32.totalorder %s1111_s17, 0  ;;  %s1113_s22 = smov [#allocation7]  }
   0x9   : > { %s1300_s20 = smov (%p34_p1, %s32_s20), 0  ;;  %s192_s23 = sshll.u32 %s1113_s22, 4  ;;  %s193_s23 = int_to_ptr.vmem [resolvable:$true] %s192_s23 }
   0xa   : > { %p1178_p4 = pnand %p945_p3, %p944_p2  ;;  %p846_p5 = scmp.ge.s32.totalorder %s1111_s17, 1 }
   0xb   : > { %s1042_s24 = scalar_lea.vmem %s193_s23, 1024  ;;  %s1049_s25 = scalar_lea.vmem %s193_s23, 2048 }
   0xc   : > { %p1033_p6 = pneg %p1178_p4  ;;  %p1043_p7 = scmp.ne.s32.totalorder %s193_s23, %s1042_s24 }
   0xd   : > { %p1050_p10 = scmp.lt.s32.totalorder %s193_s23, %s193_s23  ;;  %p1051_p11 = scmp.lt.s32.totalorder %s1049_s25, %s1042_s24 }
   0xe   : > { %p1045_p8 = pnand %p1043_p7, %p1033_p6 }
   0xf   : > { %p1052_p12 = por %p1051_p11, %p1050_p10 }
  0x10   : > { %p1046_p9 = pneg %p1045_p8 }
  0x12   : > { %p1053_p13 = pnand %p1052_p12, %p1046_p9 }
  0x14   : > { %1056 = shalt.err (!%p1053_p13)
}
  0x15   : > { %s1114_s26 = smov 64   ;;  %s1115_s27 = smov 4  }
  0x16   : > { %939 = dma.hbm_to_vmem [thread:$0]  (!%p1178_p4), %s1287_s1, 1024, %s193_s23, [#allocation8], %s1114_s26, %s1114_s26, %s1115_s27  }
  0x17   : > { %p200_p1 = scmp.lt.s32.totalorder %s1111_s17, 3 }
  0x19   : > { %p201_p2 = pnand %p846_p5, %p200_p1 }
  0x1a   : > { %p946_p3 = scmp.eq.s32.totalorder (!%p201_p2), %s841_s18, 0 }
  0x1b   : > { %204 = sbr.rel (%p201_p2) target bundleno = 1804 (0x70c), region = 36 }
  0x20   : > { %1094 = dma.done.wait (%p946_p3), [#allocation8], 1024  }
  0x21   : > { %1096 = vsyncadd (%p946_p3), [#allocation8], 4294966272  ;;  %p239_p6 = scmp.eq.s32.totalorder %s1103_s15, 0 }
  0x22   : > { %v245_v0 = vld [vmem:[%s1286_s0] sm:$0xff] (%p239_p6)  ;;  %v246_v1 = vld [vmem:[%s1286_s0 + $0x8] sm:$0xff] (%p239_p6)  ;;  %vm327_vm0 = vcmask (%p239_p6), 7168   ;;  %v1116_v4 = vmov (%p239_p6), 0.0   ;;  %v1117_v5 = vmov (%p239_p6), -inf   ;;  %vm1118_vm1 = vmmov (%p239_p6), 0  }
  0x23   : > { %244 = sbr.rel (!%p239_p6) target bundleno = 423 (0x1a7), region = 44  ;;  %v247_v2 = vmul.f32 (%p239_p6), %v245_v0, %v245_v0  ;;  %v248_v3 = vmul.f32 (%p239_p6), %v246_v1, %v246_v1  ;;  %893 = vmatprep.subr.bf16.mxu0 (%p239_p6), %v1116_v4  ;;  %328 = vst.msk [vmem:[#allocation4] sm:$0xff] (%p239_p6), %vm327_vm0, %v1117_v5  ;;  %329 = vst.msk [vmem:[#allocation4 + $0x8] sm:$0xff] (%p239_p6), %vm327_vm0, %v1117_v5  ;;  %895 = vmatprep.mubr.msk.bf16.mxu0 (%p239_p6), %vm1118_vm1, %v1116_v4  ;;  %vm324_vm6 = vcmask (%p239_p6), 130048  }
  0x24   : > { %330 = vst.msk [vmem:[#allocation5] sm:$0xff] (%p239_p6), %vm327_vm0, %v1116_v4  ;;  %331 = vst.msk [vmem:[#allocation5 + $0x8] sm:$0xff] (%p239_p6), %vm327_vm0, %v1116_v4 }
  0x25   : > { %249 = vadd.xlane.f32.xlu0 (%p239_p6), %v247_v2 }
  0x29   : > { %251 = vadd.xlane.f32.xlu0 %v248_v3 }
  0xae   : > { %v250_v6 = vpop.xlane.xlu0 %249 }
  0xaf   : > { %991 = vrsqrt.f32 %v250_v6  ;;  %vm255_vm2 = vcmp.eq.f32.partialorder %v250_v6, inf  ;;  %v258_v10 = vand.u32 2147483648, %v250_v6  ;;  %vm257_vm3 = vcmp.eq.f32.partialorder %v250_v6, 0.0 }
  0xb2   : > { %v252_v7 = vpop.xlane.xlu0 %251 }
  0xb3   : > { %993 = vrsqrt.f32 %v252_v7  ;;  %vm262_vm4 = vcmp.eq.f32.partialorder %v252_v7, inf  ;;  %v265_v16 = vand.u32 2147483648, %v252_v7  ;;  %vm264_vm5 = vcmp.eq.f32.partialorder %v252_v7, 0.0 }
  0xbc   : > { %v992_v8 = vpop.eup %991 }
  0xbd   : > { %v254_v9 = vmul.f32 %v992_v8, %v250_v6 }
  0xbf   : > { %v256_v11 = vsel %vm255_vm2, %v250_v6, %v254_v9 }
  0xc0   : > { %v994_v12 = vpop.eup %993  ;;  %v259_v13 = vsel %vm257_vm3, %v258_v10, %v256_v11 }
  0xc1   : > { %v267_v14 = vmax.f32 %v259_v13, 1e-12  ;;  %v261_v15 = vmul.f32 %v994_v12, %v252_v7 }
  0xc3   : > { %v263_v17 = vsel %vm262_vm4, %v252_v7, %v261_v15  ;;  %995 = vrcp.f32 %v267_v14 }
  0xc4   : > { %v266_v18 = vsel %vm264_vm5, %v265_v16, %v263_v17 }
  0xc5   : > { %v268_v19 = vmax.f32 %v266_v18, 1e-12 }
  0xc7   : > { %997 = vrcp.f32 %v268_v19 }
  0xd0   : > { %v996_v20 = vpop.eup %995 }
  0xd1   : > { %v270_v22 = vmul.f32 %v996_v20, %v245_v0 }
  0xd4   : > { %v998_v21 = vpop.eup %997 }
  0xd5   : > { %v272_v23 = vmul.f32 %v998_v21, %v246_v1 }
  0xd7   : > { %v273_v24 = vpack.c.bf16 %v272_v23, %v270_v22 }
  0xd9   : > { %877 = vst [vmem:[#allocation2] sm:$0xff] %v273_v24   ;;  %894 = vmatpush3.bf16.xpose.msra.mxu0 %v273_v24 }
  0xe0   : > { %896 = vmatmul.mubr.bf16.vlgmr.msra.gmra.mxu0 %v273_v24 }
 0x1a0   : > { %v317_v25 = vpop.f32.mrf.mxu0 }
 0x1a1   : > { %325 = vst.msk [vmem:[#allocation3] sm:$0xff] %vm324_vm6, %v317_v25 }
 0x1a2   : > { %v897_v26 = vpop.f32.mrf.mxu0 }
 0x1a4   : > { %v320_v27 = vpop.f32.mrf.mxu0 }
 0x1a5   : > { %326 = vst.msk [vmem:[#allocation3 + $0x8] sm:$0xff] %vm324_vm6, %v320_v27 }
 0x1a6   : > { %v898_v28 = vpop.f32.mrf.mxu0 }
 0x1a7 PF: > { %v337_v29 = vld [vmem:[%s1288_s2] sm:$0xff]  ;;  %v1119_v30 = vmov 0   ;;  %v338_v31 = vld [vmem:[%s1288_s2 + $0x8] sm:$0xff]  ;;  %v333_v32 = vlaneseq  ;;  %p851_p4 = scmp.ne.s32.totalorder %s1103_s15, 0 }
 0x1a8   : > { %999 = vset.pattern.permute.xlu0 %v1119_v30 }
 0x1a9   : > { %340 = vperm.xlu0 %999, %v337_v29   ;;  %v1208_v33 = vand.u32 127, %v333_v32 }
 0x1ad   : > { %343 = vperm.xlu0 %999, %v338_v31  }
 0x224   : > { %v341_v34 = vpop.permute.xlu0 %340 }
 0x225   : > { %vm1211_vm7 = vcmp.eq.s32.totalorder %v1208_v33, %v341_v34  ;;  %349 = sbr.rel (%p851_p4) target bundleno = 1217 (0x4c1), region = 48 }
 0x228   : > { %v344_v36 = vpop.permute.xlu0 %343 }
 0x229   : > { %vm1216_vm8 = vcmp.eq.s32.totalorder %v1208_v33, %v344_v36 }
 0x22a   : > { %v1002_v38 = vld [vmem:[#allocation7 + $0x38] sm:$0xff]   ;;  %v1120_v39 = vmov 0.0   ;;  %v1003_v40 = vld [vmem:[#allocation7 + $0x30] sm:$0xff]   ;;  %vm1121_vm9 = vmmov 0   ;;  %v1004_v41 = vld [vmem:[#allocation7 + $0x28] sm:$0xff]   ;;  %v1122_v54 = vmov 0.25  }
 0x22b   : > { %899 = vmatprep.subr.bf16.mxu0 %v1120_v39  ;;  %915 = vmatprep.mubr.msk.bf16.mxu0 %vm1121_vm9, %v1120_v39  ;;  %v1005_v42 = vld [vmem:[#allocation7 + $0x20] sm:$0xff]   ;;  %v1006_v43 = vld [vmem:[#allocation7 + $0x18] sm:$0xff]   ;;  %v1007_v44 = vld [vmem:[#allocation7 + $0x10] sm:$0xff]   ;;  %v477_v55 = vsel %vm1211_vm7, 0.75, %v1122_v54  ;;  %vm485_vm10 = vcmp.lt.s32.totalorder %v1208_v33, 16  ;;  %v478_v1 = vsel %vm1216_vm8, 0.75, %v1122_v54 }
 0x22c   : > { %900 = vmatpush3.bf16.msra.mxu0 %v1002_v38  ;;  %v1008_v45 = vld [vmem:[#allocation7 + $0x8] sm:$0xff]   ;;  %v1009_v46 = vld [vmem:[#allocation7] sm:$0xff]   ;;  %v1010_v47 = vld [vmem:[#allocation2] sm:$0xff]   ;;  %v1123_v9 = vmov 0   ;;  %vm528_vm11 = vcmask 7168  }
 0x22d   : > { %901 = vmatprep.subr.bf16.mxu0 %v1120_v39  ;;  %1000 = vset.pattern.permute.xlu1 %v1123_v9  ;;  %v488_v10 = vld [vmem:[#allocation4] sm:$0xff]  ;;  %v489_v13 = vld [vmem:[#allocation4 + $0x8] sm:$0xff]  ;;  %v496_v29 = vld [vmem:[#allocation5] sm:$0xff] }
 0x22e   : > { %1001 = vset.pattern.permute.xlu0 %v1123_v9  ;;  %v497_v34 = vld [vmem:[#allocation5 + $0x8] sm:$0xff] }
 0x230   : > { %902 = vmatpush3.bf16.msra.mxu0 %v1003_v40 }
 0x231   : > { %903 = vmatprep.subr.bf16.mxu0 %v1120_v39 }
 0x234   : > { %904 = vmatpush3.bf16.msra.mxu0 %v1004_v41 }
 0x235   : > { %905 = vmatprep.subr.bf16.mxu0 %v1120_v39 }
 0x238   : > { %906 = vmatpush3.bf16.msra.mxu0 %v1005_v42 }
 0x239   : > { %907 = vmatprep.subr.bf16.mxu0 %v1120_v39 }
 0x23c   : > { %908 = vmatpush3.bf16.msra.mxu0 %v1006_v43 }
 0x23d   : > { %909 = vmatprep.subr.bf16.mxu0 %v1120_v39 }
 0x240   : > { %910 = vmatpush3.bf16.msra.mxu0 %v1007_v44 }
 0x241   : > { %911 = vmatprep.subr.bf16.mxu0 %v1120_v39 }
 0x244   : > { %912 = vmatpush3.bf16.msra.mxu0 %v1008_v45 }
 0x245   : > { %913 = vmatprep.subr.bf16.mxu0 %v1120_v39 }
 0x248   : > { %914 = vmatpush3.bf16.msra.mxu0 %v1009_v46 }
 0x24b   : > { %916 = vmatmul.mubr.bf16.vlgmr.msra.gmra.mxu0 %v1010_v47 }
 0x30b   : > { %v456_v48 = vpop.f32.mrf.mxu0 }
 0x30c   : > { %465 = vst [vmem:[#allocation6] sm:$0xff] %v456_v48  ;;  %v467_v49 = vsub.f32 1.25, %v456_v48  ;;  %v471_v50 = vadd.f32 0.25, %v456_v48  ;;  %v481_v62 = vsub.f32 %v456_v48, %v477_v55 }
 0x30d   : > { %v917_v51 = vpop.f32.mrf.mxu0 }
 0x30e   : > { %v469_v52 = vmax.f32 %v467_v49, 0.0  ;;  %v473_v53 = vmax.f32 %v471_v50, 0.0 }
 0x30f   : > { %v459_v56 = vpop.f32.mrf.mxu0 }
 0x310   : > { %466 = vst [vmem:[#allocation6 + $0x8] sm:$0xff] %v459_v56  ;;  %v468_v57 = vsub.f32 1.25, %v459_v56  ;;  %v472_v58 = vadd.f32 0.25, %v459_v56  ;;  %v475_v59 = vsel %vm1211_vm7, %v469_v52, %v473_v53  ;;  %v482_v6 = vsub.f32 %v459_v56, %v478_v1 }
 0x311   : > { %v918_v60 = vpop.f32.mrf.mxu0  ;;  %v479_v61 = vmul.f32 64.0, %v475_v59 }
 0x312   : > { %v470_v63 = vmax.f32 %v468_v57, 0.0  ;;  %v474_v0 = vmax.f32 %v472_v58, 0.0 }
 0x313   : > { %v483_v2 = vmul.f32 %v481_v62, %v479_v61 }
 0x314   : > { %v476_v3 = vsel %vm1216_vm8, %v470_v63, %v474_v0 }
 0x315   : > { %v486_v4 = vsel %vm485_vm10, %v483_v2, -1e+30  ;;  %v480_v5 = vmul.f32 64.0, %v476_v3 }
 0x316   : > { %490 = vmax.xlane.f32.xlu0 %v486_v4 }
 0x317   : > { %v484_v7 = vmul.f32 %v482_v6, %v480_v5 }
 0x319   : > { %v487_v8 = vsel %vm485_vm10, %v484_v7, -1e+30 }
 0x31a   : > { %492 = vmax.xlane.f32.xlu0 %v487_v8 }
 0x39f   : > { %v491_v11 = vpop.xlane.xlu0 %490 }
 0x3a0   : > { %v494_v12 = vmax.f32 %v488_v10, %v491_v11 }
 0x3a2   : > { %v498_v14 = vsub.f32 %v488_v10, %v494_v12  ;;  %531 = vst.msk [vmem:[#allocation4] sm:$0xff] %vm528_vm11, %v494_v12  ;;  %508 = vperm.xlu1 %1000, %v494_v12  }
 0x3a3   : > { %v493_v15 = vpop.xlane.xlu0 %492 }
 0x3a4   : > { %v495_v16 = vmax.f32 %v489_v13, %v493_v15  ;;  %v500_v26 = vmul.f32 1.442695, %v498_v14 }
 0x3a6   : > { %v499_v17 = vsub.f32 %v489_v13, %v495_v16  ;;  %532 = vst.msk [vmem:[#allocation4 + $0x8] sm:$0xff] %vm528_vm11, %v495_v16  ;;  %513 = vperm.xlu1 %1000, %v495_v16  }
 0x3a8   : > { %v502_v27 = vmul.f32 1.442695, %v499_v17 }
 0x41d   : > { %v509_v18 = vpop.permute.xlu1 %508 }
 0x41e   : > { %v516_v19 = vsub.f32 %v486_v4, %v509_v18 }
 0x420   : > { %v518_v20 = vmul.f32 1.442695, %v516_v19 }
 0x421   : > { %v514_v21 = vpop.permute.xlu1 %513 }
 0x422   : > { %1011 = vpow2.f32 %v518_v20  ;;  %v517_v22 = vsub.f32 %v487_v8, %v514_v21 }
 0x424   : > { %v520_v23 = vmul.f32 1.442695, %v517_v22 }
 0x426   : > { %1013 = vpow2.f32 %v520_v23 }
 0x427   : > { %1015 = vpow2.f32 %v500_v26 }
 0x428   : > { %1017 = vpow2.f32 %v502_v27 }
 0x42f   : > { %v1012_v24 = vpop.eup %1011 }
 0x430   : > { %522 = vadd.xlane.f32.xlu0 %v1012_v24 }
 0x433   : > { %v1014_v25 = vpop.eup %1013 }
 0x434   : > { %524 = vadd.xlane.f32.xlu1 %v1014_v25  ;;  %v1016_v28 = vpop.eup %1015 }
 0x435   : > { %v504_v30 = vmul.f32 %v1016_v28, %v496_v29  ;;  %v1018_v31 = vpop.eup %1017 }
 0x436   : > { %v505_v38 = vmul.f32 %v1018_v31, %v497_v34 }
 0x4b9   : > { %v523_v32 = vpop.xlane.xlu0 %522 }
 0x4ba   : > { %v526_v36 = vadd.f32 %v523_v32, %v504_v30 }
 0x4bc   : > { %529 = vst.msk [vmem:[#allocation5] sm:$0xff] %vm528_vm11, %v526_v36 }
 0x4bd   : > { %v525_v39 = vpop.xlane.xlu1 %524 }
 0x4be   : > { %v527_v40 = vadd.f32 %v525_v39, %v505_v38 }
 0x4c0   : > { %530 = vst.msk [vmem:[#allocation5 + $0x8] sm:$0xff] %vm528_vm11, %v527_v40 }
 0x4c1 PF: > { %p861_p5 = scmp.ne.s32.totalorder %s1103_s15, 1 }
 0x4c3   : > { %536 = sbr.rel (%p861_p5) target bundleno = 1790 (0x6fe), region = 52 }
 0x4c8   : > { %v562_v41 = vld [vmem:[%s1289_s3] sm:$0xff]  ;;  %v563_v42 = vld [vmem:[%s1289_s3 + $0x8] sm:$0xff]  ;;  %vm564_vm12 = vcmask 7168   ;;  %v582_v46 = vld [vmem:[#allocation4] sm:$0xff]  ;;  %v1124_v49 = vmov 0   ;;  %vm638_vm13 = vcmask 130048  }
 0x4c9   : > { %v565_v43 = vsel %vm564_vm12, %v562_v41, 0.0  ;;  %v566_v44 = vsel %vm564_vm12, %v563_v42, 0.0  ;;  %v583_v47 = vld [vmem:[#allocation4 + $0x8] sm:$0xff]  ;;  %v601_v48 = vld [vmem:[#allocation5 + $0x8] sm:$0xff]  ;;  %1020 = vset.pattern.permute.xlu1 %v1124_v49  ;;  %1019 = vset.pattern.permute.xlu0 %v1124_v49  ;;  %v600_v51 = vld [vmem:[#allocation5] sm:$0xff]  ;;  %v1125_v13 = vmov 0.25  }
 0x4ca   : > { %v567_v45 = vadd.f32 %v566_v44, %v565_v43  ;;  %1021 = vrcp.f32 %v601_v48  ;;  %586 = vperm.xlu1 %1020, %v582_v46   ;;  %v636_v1 = vld [vmem:[#allocation3] sm:$0xff]  ;;  %v540_v2 = vld [vmem:[#allocation6 + $0x8] sm:$0xff]  ;;  %v539_v5 = vld [vmem:[#allocation6] sm:$0xff]  ;;  %v552_v14 = vsel %vm1216_vm8, 0.75, %v1125_v13  ;;  %v551_v18 = vsel %vm1211_vm7, 0.75, %v1125_v13 }
 0x4cb   : > { %1023 = vrcp.f32 %v600_v51  ;;  %923 = vmatprep.mubr.msk.f32.mxu0 %vm638_vm13, %v636_v1  ;;  %v542_v3 = vsub.f32 1.25, %v540_v2  ;;  %v546_v4 = vadd.f32 0.25, %v540_v2  ;;  %v541_v6 = vsub.f32 1.25, %v539_v5 }
 0x4cc   : > { %568 = vadd.xlane.f32.xlu0 %v567_v45  ;;  %v545_v7 = vadd.f32 0.25, %v539_v5  ;;  %v556_v16 = vsub.f32 %v540_v2, %v552_v14  ;;  %v555_v20 = vsub.f32 %v539_v5, %v551_v18  ;;  %vm559_vm14 = vcmp.lt.s32.totalorder %v1208_v33, 16 }
 0x4cd   : > { %v544_v8 = vmax.f32 %v542_v3, 0.0  ;;  %v548_v9 = vmax.f32 %v546_v4, 0.0  ;;  %v543_v10 = vmax.f32 %v541_v6, 0.0  ;;  %v1126_v39 = vmov 0.0  }
 0x4ce   : > { %v547_v11 = vmax.f32 %v545_v7, 0.0  ;;  %v863_v33 = vsel %vm1216_vm8, 1.0, %v1126_v39  ;;  %v862_v43 = vsel %vm1211_vm7, 1.0, %v1126_v39 }
 0x4cf   : > { %v550_v12 = vsel %vm1216_vm8, %v544_v8, %v548_v9 }
 0x4d0   : > { %v554_v15 = vmul.f32 64.0, %v550_v12  ;;  %v549_v17 = vsel %vm1211_vm7, %v543_v10, %v547_v11 }
 0x4d1   : > { %v553_v19 = vmul.f32 64.0, %v549_v17 }
 0x4d2   : > { %v558_v21 = vmul.f32 %v556_v16, %v554_v15 }
 0x4d3   : > { %v557_v22 = vmul.f32 %v555_v20, %v553_v19 }
 0x4d4   : > { %v561_v24 = vsel %vm559_vm14, %v558_v21, -1e+30 }
 0x4d5   : > { %v560_v27 = vsel %vm559_vm14, %v557_v22, -1e+30 }
 0x4d7   : > { %v1022_v50 = vpop.eup %1021 }
 0x4d8   : > { %611 = vperm.xlu1 %1020, %v1022_v50   ;;  %v1024_v52 = vpop.eup %1023  ;;  %v637_v50 = vld [vmem:[#allocation3 + $0x8] sm:$0xff] }
 0x4dc   : > { %606 = vperm.xlu1 %1020, %v1024_v52  }
 0x4e2   : > { %591 = vperm.xlu0 %1019, %v583_v47  }
 0x545   : > { %v587_v26 = vpop.permute.xlu1 %586 }
 0x546   : > { %v594_v28 = vsub.f32 %v560_v27, %v587_v26 }
 0x548   : > { %v596_v30 = vmul.f32 1.442695, %v594_v28 }
 0x553   : > { %v612_v31 = vpop.permute.xlu1 %611 }
 0x555   : > { %v569_v53 = vpop.xlane.xlu0 %568 }
 0x556   : > { %v570_v54 = vrot.slane %v569_v53, 4 }
 0x557   : > { %v607_v38 = vpop.permute.xlu1 %606 }
 0x558   : > { %v571_v55 = vadd.f32 %v570_v54, %v569_v53 }
 0x55a   : > { %v572_v56 = vrot.slane %v571_v55, 2 }
 0x55c   : > { %v573_v57 = vadd.f32 %v572_v56, %v571_v55 }
 0x55d   : > { %v592_v23 = vpop.permute.xlu0 %591 }
 0x55e   : > { %v574_v58 = vrot.slane %v573_v57, 1  ;;  %v595_v25 = vsub.f32 %v561_v24, %v592_v23 }
 0x560   : > { %v575_v59 = vadd.f32 %v574_v58, %v573_v57  ;;  %v598_v29 = vmul.f32 1.442695, %v595_v25 }
 0x562   : > { %926 = vpush %v575_v59 }
 0x593   : > { %s927_s15 = spop %926 }
 0x594   : > { %v577_v60 = vstv %s927_s15 }
 0x595   : > { %v578_v61 = vmax.f32 %v577_v60, 1.0 }
 0x597   : > { %1025 = vrcp.f32 %v578_v61 }
 0x598   : > { %1027 = vpow2.f32 %v598_v29 }
 0x599   : > { %1029 = vpow2.f32 %v596_v30 }
 0x5a4   : > { %v1026_v62 = vpop.eup %1025 }
 0x5a5   : > { %v581_v63 = vmul.f32 %v1026_v62, %v563_v42  ;;  %v580_v0 = vmul.f32 %v1026_v62, %v562_v41  ;;  %v1028_v32 = vpop.eup %1027 }
 0x5a6   : > { %v615_v34 = vmul.f32 %v1028_v32, %v612_v31  ;;  %v1030_v36 = vpop.eup %1029 }
 0x5a7   : > { %629 = vperm.xlu1 %1020, %v581_v63   ;;  %v614_v40 = vmul.f32 %v1030_v36, %v607_v38 }
 0x5a8   : > { %v621_v41 = vsub.f32 %v615_v34, %v863_v33 }
 0x5a9   : > { %v620_v45 = vsub.f32 %v614_v40, %v862_v43 }
 0x5ab   : > { %624 = vperm.xlu1 %1020, %v580_v0  }
 0x622   : > { %v630_v42 = vpop.permute.xlu1 %629 }
 0x623   : > { %v633_v44 = vmul.f32 %v630_v42, %v621_v41 }
 0x625   : > { %v635_v46 = vmul.f32 %v633_v44, %v554_v15 }
 0x626   : > { %v625_v47 = vpop.permute.xlu1 %624 }
 0x627   : > { %v632_v48 = vmul.f32 %v625_v47, %v620_v45  ;;  %919 = vmatprep.subr.mxu0 %v635_v46 }
 0x628   : > { %920 = vmatpush3.msra.mxu0 %v635_v46 }
 0x629   : > { %v634_v49 = vmul.f32 %v632_v48, %v553_v19 }
 0x62b   : > { %921 = vmatprep.subr.mxu0 %v634_v49 }
 0x62c   : > { %922 = vmatpush3.msra.mxu0 %v634_v49 }
 0x62d   : > { %924 = vmatmul.mubr.msk.f32.vlgmr.msra.gmra.mxu0 %vm638_vm13, %v637_v50 }
 0x6ed   : > { %v925_v51 = vpop.f32.mrf.mxu0 }
 0x6ee   : > { %v721_v52 = vmul.f32 0.1, %v925_v51 }
 0x6ef   : > { %v711_v53 = vpop.f32.mrf.mxu0 }
 0x6f0   : > { %v723_v54 = vsub.f32 %v540_v2, %v721_v52  ;;  %v720_v55 = vmul.f32 0.1, %v711_v53 }
 0x6f2   : > { %v725_v56 = vsub.f32 1.25, %v723_v54  ;;  %v729_v57 = vadd.f32 0.25, %v723_v54  ;;  %v722_v58 = vsub.f32 %v539_v5, %v720_v55  ;;  %v737_v4 = vsub.f32 %v723_v54, %v552_v14 }
 0x6f4   : > { %v727_v59 = vmax.f32 %v725_v56, 0.0  ;;  %v731_v60 = vmax.f32 %v729_v57, 0.0  ;;  %v724_v61 = vsub.f32 1.25, %v722_v58  ;;  %v728_v62 = vadd.f32 0.25, %v722_v58 }
 0x6f5   : > { %v736_v8 = vsub.f32 %v722_v58, %v551_v18 }
 0x6f6   : > { %v733_v63 = vsel %vm1216_vm8, %v727_v59, %v731_v60  ;;  %v726_v0 = vmax.f32 %v724_v61, 0.0  ;;  %v730_v1 = vmax.f32 %v728_v62, 0.0 }
 0x6f7   : > { %v735_v3 = vmul.f32 64.0, %v733_v63 }
 0x6f8   : > { %v732_v6 = vsel %vm1211_vm7, %v726_v0, %v730_v1 }
 0x6f9   : > { %v739_v7 = vmul.f32 %v737_v4, %v735_v3  ;;  %v734_v2 = vmul.f32 64.0, %v732_v6 }
 0x6fb   : > { %741 = vst [vmem:[#allocation10 + $0x8] sm:$0xff] %v739_v7  ;;  %v738_v9 = vmul.f32 %v736_v8, %v734_v2 }
 0x6fd   : > { %740 = vst [vmem:[#allocation10] sm:$0xff] %v738_v9 }
 0x6fe PF: > { %p1262_p7 = scmp.eq.s32.totalorder %s841_s18, 1  ;;  %s1127_s23 = smov [#allocation10]  }
 0x6ff   : > { %s756_s24 = sshll.u32 %s1127_s23, 4  ;;  %s757_s24 = int_to_ptr.vmem [resolvable:$true] %s756_s24 }
 0x700   : > { %s1057_s25 = scalar_lea.vmem %s757_s24, 256  ;;  %s1063_s26 = scalar_lea.vmem %s757_s24, 512 }
 0x701   : > { %p1058_p8 = scmp.ne.s32.totalorder %s757_s24, %s1057_s25  ;;  %p1064_p11 = scmp.lt.s32.totalorder %s757_s24, %s757_s24 }
 0x702   : > { %p1065_p12 = scmp.lt.s32.totalorder %s1063_s26, %s1057_s25 }
 0x703   : > { %p1059_p9 = pnand %p1058_p8, %p1262_p7 }
 0x704   : > { %p1066_p13 = por %p1065_p12, %p1064_p11 }
 0x705   : > { %p1060_p10 = pneg %p1059_p9 }
 0x707   : > { %p1067_p1 = pnand %p1066_p13, %p1060_p10 }
 0x709   : > { %1070 = shalt.err (!%p1067_p1)
}
 0x70a   : > { %s1128_s27 = smov 128   ;;  %s1129_s18 = smov 8  }
 0x70b   : > { %933 = dma.vmem_to_hbm [thread:$0]  (%p1262_p7), %s757_s24, 256, %s1290_s4, [#allocation9], %s1128_s27, %s1128_s27, %s1129_s18  }
 0x70c PF: > { %p949_p2 = scmp.eq.s32.totalorder %s842_s19, 1 }
 0x70e   : > { %p941_p3 = pnand %p949_p2, %p844_p0 }
 0x710   : > { %p942_p6 = pneg %p941_p3 }
 0x712   : > { %1098 = dma.done.wait (%p942_p6), [#allocation9], 256  }
 0x713   : > { %1100 = vsyncadd (%p942_p6), [#allocation9], 4294967040  ;;  %s20_s17 = sadd.s32 1, %s1111_s17   ;;  %s1297_s15 = smov %s1107_s16 }
 0x714   : > { %p17_p4 = scmp.ge.s32.totalorder %s20_s17, 4   ;;  %s1298_s16 = smov %s1300_s20 }
 0x716   :  { %19 = sbr.rel (!%p17_p4) target bundleno = 5 (0x5), region = 95 }
 0x71b   :  { %777 = vsyncpa [#allocation8], 1 }
 0x71c   :  { %779 = vsyncpa [#allocation8 + $0x1], 1 }
 0x71d   :  { %780 = vsyncpa [#allocation9], 1 }
 0x71e   :  { %782 = vsyncpa [#allocation9 + $0x1], 1 }

</bundles_post_ra>
